<compile_context>
chip_gen: v6e
topology: v6e:2x2x1
jax: 0.10.0
libtpu: 0.0.40
codegen_flags: <defaults>
</compile_context>

<pallas_src>
import functools

import jax
import jax.numpy as jnp
from jax.experimental import pallas as pl
from jax.experimental.pallas import tpu as pltpu

HID1_PAD = 512   # 400 padded to a multiple of 128
HID2_PAD = 384   # 300 padded to a multiple of 128
ACT_PAD = 128    # act_size padded to one full lane tile (lane-dense store)


def _round_up(x, m):
    return (x + m - 1) // m * m


def _choose_tile_b(B):
    """Pick the batch tile.

    Constraints / preferences (in order):
      * multiple of 16 (bf16 sublane tile keeps the MXU LHS layout clean),
      * at least 2 grid steps when B > 16 (v7x megacore gets both TCs busy),
      * batch-padding waste <= ~12.5% (or <= 16 rows),
      * as large as possible within the above (amortize ~0.35us/grid-step).
    """
    if B <= 16:
        return 16                              # single tile; cannot split further
    best = 16
    for t in (32, 64, 128, 256, 512, 1024):
        if 2 * t > _round_up(B, 16):
            break                              # would collapse to a single grid step
        waste = _round_up(B, t) - B
        if waste <= max(16, B // 8):           # bound padded-row waste
            best = t
    return best


def _vmem_limit_bytes(tile_b, obs):
    """Derive a safe scoped-VMEM limit for this tile size (2x margin + 8 MiB)."""
    # bf16 weights + f32 biases, double-buffered by the BlockSpec pipeline.
    w_bytes = 2 * 2 * (obs * HID1_PAD + HID1_PAD * HID2_PAD + HID2_PAD * ACT_PAD)
    b_bytes = 2 * 4 * (HID1_PAD + HID2_PAD + ACT_PAD)
    # f32 x tile + bf16 out tile, double-buffered.
    io_bytes = 2 * (tile_b * obs * 4 + tile_b * ACT_PAD * 2)
    # f32 h1/h2 intermediates + their bf16 casts.
    act_bytes = tile_b * (HID1_PAD + HID2_PAD) * 6
    total = w_bytes + b_bytes + io_bytes + act_bytes
    return int(min(2 * total + (8 << 20), 64 << 20))   # clamp: v7x has 64 MiB VMEM


def _ddpg_actor_kernel(x_ref, w1_ref, b1_ref, w2_ref, b2_ref, w3_ref, b3_ref,
                       o_ref):
    """Fused 3-layer MLP: bf16 MXU matmuls with f32 accumulation."""
    x = x_ref[...].astype(jnp.bfloat16)                      # in-kernel cast (VPU)

    # Layer 1: Linear(obs, 512) + ReLU
    h1 = jnp.dot(x, w1_ref[...], preferred_element_type=jnp.float32)
    h1 = jnp.maximum(h1 + b1_ref[...], 0.0)                  # f32 on VPU

    # Layer 2: Linear(512, 384) + ReLU
    h2 = jnp.dot(h1.astype(jnp.bfloat16), w2_ref[...],
                 preferred_element_type=jnp.float32)
    h2 = jnp.maximum(h2 + b2_ref[...], 0.0)

    # Layer 3: Linear(384, 128) + Tanh   (tanh -> EUP), bf16 store
    h3 = jnp.dot(h2.astype(jnp.bfloat16), w3_ref[...],
                 preferred_element_type=jnp.float32)
    o_ref[...] = jnp.tanh(h3 + b3_ref[...]).astype(o_ref.dtype)


@functools.partial(jax.jit, static_argnames=("act_size",))
def ddpg_actor_forward(x, params, *, act_size):
    """x: (B, obs_size) float32. params: padded bf16 weights + f32 biases."""
    B, obs = x.shape
    w1, b1 = params["w1"], params["b1"]
    w2, b2 = params["w2"], params["b2"]
    w3, b3 = params["w3"], params["b3"]

    tile_b = _choose_tile_b(B)
    b_pad = _round_up(B, tile_b)
    if b_pad != B:
        x = jnp.pad(x, ((0, b_pad - B), (0, 0)))   # only when actually required

    grid = (b_pad // tile_b,)

    out = pl.pallas_call(
        _ddpg_actor_kernel,
        out_shape=jax.ShapeDtypeStruct((b_pad, ACT_PAD), jnp.bfloat16),
        grid=grid,
        in_specs=[
            # x tiled over batch; weights/biases VMEM-resident across the grid
            # (constant index_map -> DMA'd once, revisited every step).
            pl.BlockSpec((tile_b, obs), lambda i: (i, 0)),
            pl.BlockSpec(w1.shape, lambda i: (0, 0)),
            pl.BlockSpec(b1.shape, lambda i: (0, 0)),
            pl.BlockSpec(w2.shape, lambda i: (0, 0)),
            pl.BlockSpec(b2.shape, lambda i: (0, 0)),
            pl.BlockSpec(w3.shape, lambda i: (0, 0)),
            pl.BlockSpec(b3.shape, lambda i: (0, 0)),
        ],
        out_specs=pl.BlockSpec((tile_b, ACT_PAD), lambda i: (i, 0)),
        compiler_params=pltpu.CompilerParams(
            dimension_semantics=("parallel",),       # shard batch over v7x's 2 TCs
            vmem_limit_bytes=_vmem_limit_bytes(tile_b, obs),
        ),
    )(x, w1, b1, w2, b2, w3, b3)

    # Slice off batch padding + lane padding, return f32 like the PyTorch module.
    return out[:B, :act_size].astype(jnp.float32)


def init_params(key, obs_size, act_size):
    """PyTorch nn.Linear default init (U(-1/sqrt(fan_in), +)), then zero-pad
    to TPU-friendly shapes and cast weights to bf16 (biases stay f32)."""
    ks = jax.random.split(key, 6)

    def linear(kw, kb, fan_in, fan_out, pad_in, pad_out):
        bound = 1.0 / float(fan_in) ** 0.5
        # Stored as (in, out) == transpose of PyTorch's (out, in) weight.
        w = jax.random.uniform(kw, (fan_in, fan_out), jnp.float32, -bound, bound)
        b = jax.random.uniform(kb, (1, fan_out), jnp.float32, -bound, bound)
        w = jnp.pad(w, ((0, pad_in - fan_in), (0, pad_out - fan_out)))
        b = jnp.pad(b, ((0, 0), (0, pad_out - fan_out)))
        return w.astype(jnp.bfloat16), b

    w1, b1 = linear(ks[0], ks[1], obs_size, 400, obs_size, HID1_PAD)
    w2, b2 = linear(ks[2], ks[3], 400, 300, HID1_PAD, HID2_PAD)
    w3, b3 = linear(ks[4], ks[5], 300, act_size, HID2_PAD, ACT_PAD)
    return {"w1": w1, "b1": b1, "w2": w2, "b2": b2, "w3": w3, "b3": b3}


def reference_forward(x, p, act_size):
    """Pure-JAX reference emulating the same bf16 casts as the kernel
    (including the bf16 output store)."""
    def f32(a):
        return a.astype(jnp.float32)

    xb = f32(x.astype(jnp.bfloat16))
    h1 = jnp.maximum(xb @ f32(p["w1"]) + p["b1"], 0.0)
    h2 = jnp.maximum(f32(h1.astype(jnp.bfloat16)) @ f32(p["w2"]) + p["b2"], 0.0)
    out = jnp.tanh(f32(h2.astype(jnp.bfloat16)) @ f32(p["w3"]) + p["b3"])
    return f32(out.astype(jnp.bfloat16))[:, :act_size]


if __name__ == "__main__":
    obs_size, act_size, batch = 32, 8, 2

    key = jax.random.PRNGKey(0)
    kx, kp = jax.random.split(key)
    x = jax.random.normal(kx, (batch, obs_size), jnp.float32)
    params = init_params(kp, obs_size, act_size)

    out = ddpg_actor_forward(x, params, act_size=act_size)
    out = jax.block_until_ready(out)

    ref = reference_forward(x, params, act_size)
    assert out.shape == (batch, act_size)
    # bf16 output store: allow ~1 ulp of bf16 near |tanh| ~ 1.
    assert jnp.allclose(out, ref, atol=1e-2, rtol=1e-2), "mismatch vs reference"

    print("KERNEL_OK")
</pallas_src>

<mosaic_0001>
module attributes {stable_mosaic.version = 11 : i64} {
  func.func @_ddpg_actor_kernel(%arg0: i32, %arg1: memref<16x32xf32, #tpu.memory_space<vmem>>, %arg2: memref<32x512xbf16, #tpu.memory_space<vmem>>, %arg3: memref<1x512xf32, #tpu.memory_space<vmem>>, %arg4: memref<512x384xbf16, #tpu.memory_space<vmem>>, %arg5: memref<1x384xf32, #tpu.memory_space<vmem>>, %arg6: memref<384x128xbf16, #tpu.memory_space<vmem>>, %arg7: memref<1x128xf32, #tpu.memory_space<vmem>>, %arg8: memref<16x128xbf16, #tpu.memory_space<vmem>>) attributes {dimension_semantics = [#tpu.dimension_semantics<parallel>], iteration_bounds = array<i64: 1>, scalar_prefetch = 0 : i64, scratch_operands = 0 : i64, tpu.core_type = #tpu.core_type<tc>, window_params = [{transform_indices = @transform_0, window_bounds = array<i64: 16, 32>}, {pipeline_mode = #tpu.pipeline_mode<synchronous>, transform_indices = @transform_1, window_bounds = array<i64: 32, 512>}, {pipeline_mode = #tpu.pipeline_mode<synchronous>, transform_indices = @transform_2, window_bounds = array<i64: 1, 512>}, {pipeline_mode = #tpu.pipeline_mode<synchronous>, transform_indices = @transform_3, window_bounds = array<i64: 512, 384>}, {pipeline_mode = #tpu.pipeline_mode<synchronous>, transform_indices = @transform_4, window_bounds = array<i64: 1, 384>}, {pipeline_mode = #tpu.pipeline_mode<synchronous>, transform_indices = @transform_5, window_bounds = array<i64: 384, 128>}, {pipeline_mode = #tpu.pipeline_mode<synchronous>, transform_indices = @transform_6, window_bounds = array<i64: 1, 128>}, {transform_indices = @transform_7, window_bounds = array<i64: 16, 128>}]} {
    %c0 = arith.constant 0 : index
    %c0_0 = arith.constant 0 : index
    %0 = vector.load %arg1[%c0, %c0_0] : memref<16x32xf32, #tpu.memory_space<vmem>>, vector<16x32xf32>
    %1 = arith.truncf %0 : vector<16x32xf32> to vector<16x32xbf16>
    %c0_1 = arith.constant 0 : index
    %c0_2 = arith.constant 0 : index
    %2 = vector.load %arg2[%c0_1, %c0_2] : memref<32x512xbf16, #tpu.memory_space<vmem>>, vector<32x512xbf16>
    %cst = arith.constant dense<0.000000e+00> : vector<16x512xf32>
    %3 = tpu.matmul %1, %2, %cst {dimension_numbers = #tpu.dot_dimension_numbers<[1], [0], [0], [1], [0, 0, 1, 1], [], []>} : vector<16x32xbf16>, vector<32x512xbf16>, vector<16x512xf32> -> vector<16x512xf32>
    %c0_3 = arith.constant 0 : index
    %c0_4 = arith.constant 0 : index
    %4 = vector.load %arg3[%c0_3, %c0_4] : memref<1x512xf32, #tpu.memory_space<vmem>>, vector<1x512xf32>
    %5 = vector.broadcast %4 : vector<1x512xf32> to vector<16x512xf32>
    %6 = arith.addf %3, %5 : vector<16x512xf32>
    %cst_5 = arith.constant 0.000000e+00 : f32
    %7 = vector.broadcast %cst_5 : f32 to vector<16x512xf32>
    %8 = arith.maximumf %6, %7 : vector<16x512xf32>
    %9 = arith.truncf %8 : vector<16x512xf32> to vector<16x512xbf16>
    %c0_6 = arith.constant 0 : index
    %c0_7 = arith.constant 0 : index
    %10 = vector.load %arg4[%c0_6, %c0_7] : memref<512x384xbf16, #tpu.memory_space<vmem>>, vector<512x384xbf16>
    %cst_8 = arith.constant dense<0.000000e+00> : vector<16x384xf32>
    %11 = tpu.matmul %9, %10, %cst_8 {dimension_numbers = #tpu.dot_dimension_numbers<[1], [0], [0], [1], [0, 0, 1, 1], [], []>} : vector<16x512xbf16>, vector<512x384xbf16>, vector<16x384xf32> -> vector<16x384xf32>
    %c0_9 = arith.constant 0 : index
    %c0_10 = arith.constant 0 : index
    %12 = vector.load %arg5[%c0_9, %c0_10] : memref<1x384xf32, #tpu.memory_space<vmem>>, vector<1x384xf32>
    %13 = vector.broadcast %12 : vector<1x384xf32> to vector<16x384xf32>
    %14 = arith.addf %11, %13 : vector<16x384xf32>
    %cst_11 = arith.constant 0.000000e+00 : f32
    %15 = vector.broadcast %cst_11 : f32 to vector<16x384xf32>
    %16 = arith.maximumf %14, %15 : vector<16x384xf32>
    %17 = arith.truncf %16 : vector<16x384xf32> to vector<16x384xbf16>
    %c0_12 = arith.constant 0 : index
    %c0_13 = arith.constant 0 : index
    %18 = vector.load %arg6[%c0_12, %c0_13] : memref<384x128xbf16, #tpu.memory_space<vmem>>, vector<384x128xbf16>
    %cst_14 = arith.constant dense<0.000000e+00> : vector<16x128xf32>
    %19 = tpu.matmul %17, %18, %cst_14 {dimension_numbers = #tpu.dot_dimension_numbers<[1], [0], [0], [1], [0, 0, 1, 1], [], []>} : vector<16x384xbf16>, vector<384x128xbf16>, vector<16x128xf32> -> vector<16x128xf32>
    %c0_15 = arith.constant 0 : index
    %c0_16 = arith.constant 0 : index
    %20 = vector.load %arg7[%c0_15, %c0_16] : memref<1x128xf32, #tpu.memory_space<vmem>>, vector<1x128xf32>
    %21 = vector.broadcast %20 : vector<1x128xf32> to vector<16x128xf32>
    %22 = arith.addf %19, %21 : vector<16x128xf32>
    %23 = math.tanh %22 : vector<16x128xf32>
    %24 = arith.truncf %23 : vector<16x128xf32> to vector<16x128xbf16>
    %c0_17 = arith.constant 0 : index
    %c0_18 = arith.constant 0 : index
    %25 = vector.load %arg8[%c0_17, %c0_18] : memref<16x128xbf16, #tpu.memory_space<vmem>>, vector<16x128xbf16>
    tpu.vector_store %arg8[%c0_17, %c0_18], %24 {strides = array<i32>} : memref<16x128xbf16, #tpu.memory_space<vmem>>, vector<16x128xbf16>,
    return
  }
  func.func @transform_0(%arg0: i32) -> (i32, i32) {
    %c0_i32 = arith.constant 0 : i32
    %c0_i32_0 = arith.constant 0 : i32
    return %arg0, %c0_i32 : i32, i32
  }
  func.func @transform_1(%arg0: i32) -> (i32, i32) {
    %c0_i32 = arith.constant 0 : i32
    %c0_i32_0 = arith.constant 0 : i32
    %c0_i32_1 = arith.constant 0 : i32
    return %c0_i32, %c0_i32_0 : i32, i32
  }
  func.func @transform_2(%arg0: i32) -> (i32, i32) {
    %c0_i32 = arith.constant 0 : i32
    %c0_i32_0 = arith.constant 0 : i32
    %c0_i32_1 = arith.constant 0 : i32
    return %c0_i32, %c0_i32_0 : i32, i32
  }
  func.func @transform_3(%arg0: i32) -> (i32, i32) {
    %c0_i32 = arith.constant 0 : i32
    %c0_i32_0 = arith.constant 0 : i32
    %c0_i32_1 = arith.constant 0 : i32
    return %c0_i32, %c0_i32_0 : i32, i32
  }
  func.func @transform_4(%arg0: i32) -> (i32, i32) {
    %c0_i32 = arith.constant 0 : i32
    %c0_i32_0 = arith.constant 0 : i32
    %c0_i32_1 = arith.constant 0 : i32
    return %c0_i32, %c0_i32_0 : i32, i32
  }
  func.func @transform_5(%arg0: i32) -> (i32, i32) {
    %c0_i32 = arith.constant 0 : i32
    %c0_i32_0 = arith.constant 0 : i32
    %c0_i32_1 = arith.constant 0 : i32
    return %c0_i32, %c0_i32_0 : i32, i32
  }
  func.func @transform_6(%arg0: i32) -> (i32, i32) {
    %c0_i32 = arith.constant 0 : i32
    %c0_i32_0 = arith.constant 0 : i32
    %c0_i32_1 = arith.constant 0 : i32
    return %c0_i32, %c0_i32_0 : i32, i32
  }
  func.func @transform_7(%arg0: i32) -> (i32, i32) {
    %c0_i32 = arith.constant 0 : i32
    %c0_i32_0 = arith.constant 0 : i32
    return %arg0, %c0_i32 : i32, i32
  }
}

</mosaic_0001>

<bundles_post_ra>
// kernel: ddpg_actor_forward.1
= control target key start
LH: loop header
LB: loop body
LE: loop exit
PB: predicated region body
PF: predicated region fallthrough
CT: control target
= control target key end

     0   :  { %12 = vsyncpa [#allocation3], 0  ;;  %s1960_s0 = inlined_call_operand.vmem [shape: f32[16,32], index: 0, kind: input, shape index: {}]   ;;  %s1961_s1 = inlined_call_operand.hbm [shape: bf16[32,512], index: 1, kind: input, shape index: {}]   ;;  %s1962_s2 = inlined_call_operand.vmem [shape: f32[1,512], index: 2, kind: input, shape index: {}]   ;;  %s1963_s3 = inlined_call_operand.hbm [shape: bf16[512,384], index: 3, kind: input, shape index: {}]   ;;  %s1964_s4 = inlined_call_operand.vmem [shape: f32[1,384], index: 4, kind: input, shape index: {}]   ;;  %s1965_s5 = inlined_call_operand.hbm [shape: bf16[384,128], index: 5, kind: input, shape index: {}]   ;;  %s1966_s6 = inlined_call_operand.vmem [shape: f32[1,128], index: 6, kind: input, shape index: {}]   ;;  %s1967_s7 = inlined_call_operand.vmem [shape: bf16[16,128], index: 7, kind: output, shape index: {}]  }
   0x1   :  { %13 = vsyncpa [#allocation5], 0  ;;  %s1855_s24 = smov [#allocation4]  }
   0x2   :  { %s35_s25 = sshll.u32 %s1855_s24, 4  ;;  %s36_s25 = int_to_ptr.vmem [resolvable:$true] %s35_s25 }
   0x3   :  { %s1799_s26 = scalar_lea.vmem %s36_s25, 12288  ;;  %p1804_p1 = scmp.lt.s32.totalorder %s36_s25, %s36_s25 }
   0x4   :  { %p1800_p0 = scmp.ne.s32.totalorder %s36_s25, %s1799_s26  ;;  %p1805_p2 = scmp.lt.s32.totalorder %s1799_s26, %s1799_s26 }
   0x6   :  { %p1806_p3 = por %p1805_p2, %p1804_p1 }
   0x8   :  { %p1807_p4 = pnand %p1806_p3, %p1800_p0 }
   0xa   :  { %1810 = shalt.err (!%p1807_p4)
}
   0xb   :  { %s1856_s27 = smov 192   ;;  %s1857_s28 = smov 12  }
   0xc   :  { %41 = dma.hbm_to_vmem [thread:$0]  %s1963_s3, 12288, %s36_s25, [#allocation5], %s1856_s27, %s1856_s27, %s1857_s28  }
   0xd   :  { %s1858_s8 = smov [#allocation2]  }
   0xe   :  { %s21_s9 = sshll.u32 %s1858_s8, 4  ;;  %s22_s9 = int_to_ptr.vmem [resolvable:$true] %s21_s9 }
   0xf   :  { %s1819_s10 = scalar_lea.vmem %s22_s9, 1024  ;;  %p1824_p6 = scmp.lt.s32.totalorder %s22_s9, %s22_s9 }
  0x10   :  { %p1820_p5 = scmp.ne.s32.totalorder %s22_s9, %s1819_s10  ;;  %p1825_p7 = scmp.lt.s32.totalorder %s1819_s10, %s1819_s10 }
  0x12   :  { %p1826_p8 = por %p1825_p7, %p1824_p6 }
  0x14   :  { %p1827_p9 = pnand %p1826_p8, %p1820_p5 }
  0x16   :  { %1830 = shalt.err (!%p1827_p9)
}
  0x17   :  { %s1859_s11 = smov 256   ;;  %s1860_s12 = smov 16  }
  0x18   :  { %27 = dma.hbm_to_vmem [thread:$0]  %s1961_s1, 1024, %s22_s9, [#allocation3], %s1859_s11, %s1859_s11, %s1860_s12  }
  0x19   :  { %s1861_s15 = smov [#allocation6]  }
  0x1a   :  { %s49_s16 = sshll.u32 %s1861_s15, 4  ;;  %s50_s16 = int_to_ptr.vmem [resolvable:$true] %s49_s16 }
  0x1b   :  { %s1839_s3 = scalar_lea.vmem %s50_s16, 3072  ;;  %p1844_p11 = scmp.lt.s32.totalorder %s50_s16, %s50_s16 }
  0x1c   :  { %p1840_p10 = scmp.ne.s32.totalorder %s50_s16, %s1839_s3  ;;  %p1845_p12 = scmp.lt.s32.totalorder %s1839_s3, %s1839_s3 }
  0x1e   :  { %p1846_p13 = por %p1845_p12, %p1844_p11 }
  0x20   :  { %p1847_p0 = pnand %p1846_p13, %p1840_p10 }
  0x22   :  { %1850 = shalt.err (!%p1847_p0)
}
  0x23   :  { %s1862_s17 = smov 64   ;;  %s1863_s18 = smov 4  }
  0x24   :  { %55 = dma.hbm_to_vmem [thread:$0]  %s1965_s5, 3072, %s50_s16, [#allocation5], %s1862_s17, %s1862_s17, %s1863_s18  }
  0x25   :  { %1851 = dma.done.wait [#allocation3], 1024  }
  0x26   :  { %1852 = vsyncadd [#allocation3], 4294966272 }
  0x27   :  { %1853 = dma.done.wait [#allocation5], 15360  }
  0x28   :  { %1854 = vsyncadd [#allocation5], 4294951936  ;;  %v1864_v0 = vmov 0   ;;  %v1623_v1 = vld [vmem:[#allocation2 + $0x24] ss:$16 sps:$4 sm:$0xff]   ;;  %v69_v10 = vld [vmem:[%s1960_s0 + $0x8] sm:$0xff] }
  0x29   :  { %177 = vmatprep.mubr.bf16.mxu0 %v1864_v0  ;;  %220 = vmatprep.mubr.bf16.mxu1 %v1864_v0  ;;  %v1625_v2 = vld [vmem:[#allocation2 + $0x2c] ss:$16 sps:$4 sm:$0xff]   ;;  %v1627_v3 = vld [vmem:[#allocation2 + $0x20] ss:$16 sps:$4 sm:$0xff]   ;;  %v1628_v4 = vld [vmem:[#allocation2 + $0x28] ss:$16 sps:$4 sm:$0xff]  }
  0x2a   :  { %157 = vmatprep.subr.bf16.mxu0 %v1623_v1  ;;  %200 = vmatprep.subr.bf16.mxu1 %v1625_v2  ;;  %v1629_v5 = vld [vmem:[#allocation2 + $0x4] ss:$16 sps:$4 sm:$0xff]   ;;  %v1631_v6 = vld [vmem:[#allocation2 + $0xc] ss:$16 sps:$4 sm:$0xff]   ;;  %v1633_v7 = vld [vmem:[#allocation2] ss:$16 sps:$4 sm:$0xff]  }
  0x2b   :  { %158 = vmatpush1.bf16.msra.mxu0 %v1627_v3  ;;  %201 = vmatpush1.bf16.msra.mxu1 %v1628_v4  ;;  %v1634_v8 = vld [vmem:[#allocation2 + $0x8] ss:$16 sps:$4 sm:$0xff]   ;;  %v68_v9 = vld [vmem:[%s1960_s0] sm:$0xff]  ;;  %vm141_vm0 = vcmask 261120   ;;  %v1641_v18 = vld [vmem:[#allocation4 + $0x90] ss:$12 sps:$4 sm:$0xff]  }
  0x2c   :  { %159 = vmatprep.subr.bf16.mxu0 %v1629_v5  ;;  %202 = vmatprep.subr.bf16.mxu1 %v1631_v6  ;;  %v1635_v11 = vld [vmem:[#allocation4 + $0xa8] ss:$12 sps:$4 sm:$0xff]   ;;  %v70_v12 = vpack.c.bf16 %v69_v10, %v68_v9  ;;  %v1637_v13 = vld [vmem:[#allocation4 + $0xac] ss:$12 sps:$4 sm:$0xff]   ;;  %v1644_v19 = vld [vmem:[#allocation4 + $0x210] ss:$12 sps:$4 sm:$0xff]  }
  0x2d   :  { %v1638_v14 = vld [vmem:[#allocation4 + $0x228] ss:$12 sps:$4 sm:$0xff]   ;;  %v1640_v15 = vld [vmem:[#allocation4 + $0x22c] ss:$12 sps:$4 sm:$0xff]   ;;  %v1655_v24 = vld [vmem:[#allocation4 + $0x64] ss:$12 sps:$4 sm:$0xff]  }
  0x2e   :  { %v1643_v16 = vld [vmem:[#allocation4 + $0x94] ss:$12 sps:$4 sm:$0xff]   ;;  %v1649_v20 = vld [vmem:[#allocation4 + $0x7c] ss:$12 sps:$4 sm:$0xff]   ;;  %v1647_v22 = vld [vmem:[#allocation4 + $0x78] ss:$12 sps:$4 sm:$0xff]  }
  0x2f   :  { %160 = vmatpush1.bf16.msra.mxu0 %v1633_v7  ;;  %203 = vmatpush1.bf16.msra.mxu1 %v1634_v8  ;;  %v1646_v17 = vld [vmem:[#allocation4 + $0x214] ss:$12 sps:$4 sm:$0xff]   ;;  %v1652_v21 = vld [vmem:[#allocation4 + $0x1fc] ss:$12 sps:$4 sm:$0xff]   ;;  %v1650_v23 = vld [vmem:[#allocation4 + $0x1f8] ss:$12 sps:$4 sm:$0xff]  }
  0x30   :  { %900 = vmatprep.subr.bf16.mxu0 %v1637_v13  ;;  %943 = vmatprep.subr.bf16.mxu1 %v1640_v15  ;;  %v1658_v25 = vld [vmem:[#allocation4 + $0x1e4] ss:$12 sps:$4 sm:$0xff]   ;;  %v1653_v26 = vld [vmem:[#allocation4 + $0x60] ss:$12 sps:$4 sm:$0xff]   ;;  %v1659_v30 = vld [vmem:[#allocation4 + $0x48] ss:$12 sps:$4 sm:$0xff]  }
  0x31   :  { %v1656_v27 = vld [vmem:[#allocation4 + $0x1e0] ss:$12 sps:$4 sm:$0xff]   ;;  %v1662_v31 = vld [vmem:[#allocation4 + $0x1c8] ss:$12 sps:$4 sm:$0xff]   ;;  %v1665_v34 = vld [vmem:[#allocation4 + $0x30] ss:$12 sps:$4 sm:$0xff]  }
  0x32   :  { %1384 = vmatmul.mubr.msk.bf16.vlgmr.msra.gmra.mxu0 %vm141_vm0, %v70_v12  ;;  %1385 = vmatmul.mubr.msk.bf16.vlgmr.msra.gmra.mxu1 %vm141_vm0, %v70_v12  ;;  %v1661_v28 = vld [vmem:[#allocation4 + $0x4c] ss:$12 sps:$4 sm:$0xff]   ;;  %v1667_v32 = vld [vmem:[#allocation4 + $0x34] ss:$12 sps:$4 sm:$0xff]   ;;  %v1668_v35 = vld [vmem:[#allocation4 + $0x1b0] ss:$12 sps:$4 sm:$0xff]  }
  0x33   :  { %901 = vmatpush1.bf16.msra.mxu0 %v1635_v11  ;;  %944 = vmatpush1.bf16.msra.mxu1 %v1638_v14  ;;  %v1664_v29 = vld [vmem:[#allocation4 + $0x1cc] ss:$12 sps:$4 sm:$0xff]   ;;  %v1670_v33 = vld [vmem:[#allocation4 + $0x1b4] ss:$12 sps:$4 sm:$0xff]   ;;  %v1673_v36 = vld [vmem:[#allocation4 + $0x1c] ss:$12 sps:$4 sm:$0xff]   ;;  %v81_v14 = vlaneseq }
  0x34   :  { %902 = vmatprep.subr.bf16.mxu0 %v1643_v16  ;;  %945 = vmatprep.subr.bf16.mxu1 %v1646_v17  ;;  %v1676_v37 = vld [vmem:[#allocation4 + $0x19c] ss:$12 sps:$4 sm:$0xff]   ;;  %v1671_v38 = vld [vmem:[#allocation4 + $0x18] ss:$12 sps:$4 sm:$0xff]   ;;  %v1677_v42 = vld [vmem:[#allocation4] ss:$12 sps:$4 sm:$0xff]  }
  0x35   :  { %v1674_v39 = vld [vmem:[#allocation4 + $0x198] ss:$12 sps:$4 sm:$0xff]   ;;  %v1680_v43 = vld [vmem:[#allocation4 + $0x180] ss:$12 sps:$4 sm:$0xff]   ;;  %v1683_v46 = vld [vmem:[#allocation4 + $0x168] ss:$12 sps:$4 sm:$0xff]  }
  0x36   :  { %v1679_v40 = vld [vmem:[#allocation4 + $0x4] ss:$12 sps:$4 sm:$0xff]   ;;  %v1685_v44 = vld [vmem:[#allocation4 + $0x16c] ss:$12 sps:$4 sm:$0xff]   ;;  %v1686_v47 = vld [vmem:[#allocation4 + $0x2e8] ss:$12 sps:$4 sm:$0xff]  }
  0x37   :  { %903 = vmatpush1.bf16.msra.mxu0 %v1641_v18  ;;  %946 = vmatpush1.bf16.msra.mxu1 %v1644_v19  ;;  %v1682_v41 = vld [vmem:[#allocation4 + $0x184] ss:$12 sps:$4 sm:$0xff]   ;;  %v1688_v45 = vld [vmem:[#allocation4 + $0x2ec] ss:$12 sps:$4 sm:$0xff]   ;;  %v1691_v48 = vld [vmem:[#allocation4 + $0x154] ss:$12 sps:$4 sm:$0xff]  }
  0x38   :  { %904 = vmatprep.subr.bf16.mxu0 %v1649_v20  ;;  %947 = vmatprep.subr.bf16.mxu1 %v1652_v21  ;;  %v1694_v49 = vld [vmem:[#allocation4 + $0x2d4] ss:$12 sps:$4 sm:$0xff]   ;;  %v1689_v50 = vld [vmem:[#allocation4 + $0x150] ss:$12 sps:$4 sm:$0xff]   ;;  %v1695_v54 = vld [vmem:[#allocation4 + $0x138] ss:$12 sps:$4 sm:$0xff]  }
  0x39   :  { %v1692_v51 = vld [vmem:[#allocation4 + $0x2d0] ss:$12 sps:$4 sm:$0xff]   ;;  %v1698_v55 = vld [vmem:[#allocation4 + $0x2b8] ss:$12 sps:$4 sm:$0xff]   ;;  %v1701_v58 = vld [vmem:[#allocation4 + $0x120] ss:$12 sps:$4 sm:$0xff]  }
  0x3a   :  { %v1697_v52 = vld [vmem:[#allocation4 + $0x13c] ss:$12 sps:$4 sm:$0xff]   ;;  %v1703_v56 = vld [vmem:[#allocation4 + $0x124] ss:$12 sps:$4 sm:$0xff]   ;;  %v1704_v59 = vld [vmem:[#allocation4 + $0x2a0] ss:$12 sps:$4 sm:$0xff]  }
  0x3b   :  { %905 = vmatpush1.bf16.msra.mxu0 %v1647_v22  ;;  %948 = vmatpush1.bf16.msra.mxu1 %v1650_v23  ;;  %v1700_v53 = vld [vmem:[#allocation4 + $0x2bc] ss:$12 sps:$4 sm:$0xff]   ;;  %v1706_v57 = vld [vmem:[#allocation4 + $0x2a4] ss:$12 sps:$4 sm:$0xff]   ;;  %v1709_v60 = vld [vmem:[#allocation4 + $0x10c] ss:$12 sps:$4 sm:$0xff]  }
  0x3c   :  { %906 = vmatprep.subr.bf16.mxu0 %v1655_v24  ;;  %949 = vmatprep.subr.bf16.mxu1 %v1658_v25  ;;  %v1712_v61 = vld [vmem:[#allocation4 + $0x28c] ss:$12 sps:$4 sm:$0xff]   ;;  %v1707_v62 = vld [vmem:[#allocation4 + $0x108] ss:$12 sps:$4 sm:$0xff]   ;;  %v1713_v2 = vld [vmem:[#allocation4 + $0xf0] ss:$12 sps:$4 sm:$0xff]  }
  0x3d   :  { %v1710_v63 = vld [vmem:[#allocation4 + $0x288] ss:$12 sps:$4 sm:$0xff]   ;;  %v1716_v3 = vld [vmem:[#allocation4 + $0x270] ss:$12 sps:$4 sm:$0xff]   ;;  %v1719_v6 = vld [vmem:[#allocation4 + $0xd8] ss:$12 sps:$4 sm:$0xff]  }
  0x3e   :  { %v1715_v0 = vld [vmem:[#allocation4 + $0xf4] ss:$12 sps:$4 sm:$0xff]   ;;  %v1721_v4 = vld [vmem:[#allocation4 + $0xdc] ss:$12 sps:$4 sm:$0xff]   ;;  %v1722_v7 = vld [vmem:[#allocation4 + $0x258] ss:$12 sps:$4 sm:$0xff]  }
  0x3f   :  { %907 = vmatpush1.bf16.msra.mxu0 %v1653_v26  ;;  %950 = vmatpush1.bf16.msra.mxu1 %v1656_v27  ;;  %v1718_v1 = vld [vmem:[#allocation4 + $0x274] ss:$12 sps:$4 sm:$0xff]   ;;  %v1724_v5 = vld [vmem:[#allocation4 + $0x25c] ss:$12 sps:$4 sm:$0xff]   ;;  %v1727_v8 = vld [vmem:[#allocation4 + $0xc4] ss:$12 sps:$4 sm:$0xff]  }
  0x40   :  { %908 = vmatprep.subr.bf16.mxu0 %v1661_v28  ;;  %951 = vmatprep.subr.bf16.mxu1 %v1664_v29  ;;  %v1730_v9 = vld [vmem:[#allocation4 + $0x244] ss:$12 sps:$4 sm:$0xff]   ;;  %v1725_v10 = vld [vmem:[#allocation4 + $0xc0] ss:$12 sps:$4 sm:$0xff]   ;;  %v1922_v15 = vshrl.u32 %v81_v14, 7  ;;  %vm1866_vm1 = vmmov 0  }
  0x41   :  { %v1728_v11 = vld [vmem:[#allocation4 + $0x240] ss:$12 sps:$4 sm:$0xff]   ;;  %v1731_v12 = vld [vmem:[#allocation4 + $0x170] ss:$12 sps:$4 sm:$0xff]  }
  0x42   :  { %v1732_v13 = vld [vmem:[#allocation4 + $0x2f0] ss:$12 sps:$4 sm:$0xff]   ;;  %v87_v16 = vsub.s32 1, %v1922_v15  ;;  %v95_v17 = vsub.s32 3, %v1922_v15  ;;  %v83_v18 = vsub.s32 0, %v1922_v15  ;;  %v91_v19 = vsub.s32 2, %v1922_v15 }
  0x43   :  { %909 = vmatpush1.bf16.msra.mxu0 %v1659_v30  ;;  %952 = vmatpush1.bf16.msra.mxu1 %v1662_v31  ;;  %v79_v20 = vld [vmem:[%s1962_s2] sm:$0xf] }
  0x44   :  { %910 = vmatprep.subr.bf16.mxu0 %v1667_v32  ;;  %953 = vmatprep.subr.bf16.mxu1 %v1670_v33  ;;  %v88_v23 = vrot.slane %v79_v20, %v87_v16  ;;  %v96_v24 = vrot.slane %v79_v20, %v95_v17  ;;  %v84_v25 = vrot.slane %v79_v20, %v83_v18  ;;  %v1758_v14 = vld [vmem:[#allocation4 + $0x1a0] ss:$12 sps:$4 sm:$0xff]   ;;  %v1759_v17 = vld [vmem:[#allocation4 + $0xc8] ss:$12 sps:$4 sm:$0xff]  }
  0x45   :  { %v92_v26 = vrot.slane %v79_v20, %v91_v19  ;;  %v1760_v20 = vld [vmem:[#allocation4 + $0x248] ss:$12 sps:$4 sm:$0xff]  }
  0x47   :  { %911 = vmatpush1.bf16.msra.mxu0 %v1665_v34  ;;  %954 = vmatpush1.bf16.msra.mxu1 %v1668_v35 }
  0x48   :  { %912 = vmatprep.subr.bf16.mxu0 %v1673_v36  ;;  %955 = vmatprep.subr.bf16.mxu1 %v1676_v37 }
  0x4b   :  { %913 = vmatpush1.bf16.msra.mxu0 %v1671_v38  ;;  %956 = vmatpush1.bf16.msra.mxu1 %v1674_v39 }
  0x4c   :  { %914 = vmatprep.subr.bf16.mxu0 %v1679_v40  ;;  %957 = vmatprep.subr.bf16.mxu1 %v1682_v41 }
  0x4f   :  { %915 = vmatpush1.bf16.msra.mxu0 %v1677_v42  ;;  %958 = vmatpush1.bf16.msra.mxu1 %v1680_v43 }
  0x50   :  { %916 = vmatprep.subr.bf16.mxu0 %v1685_v44  ;;  %959 = vmatprep.subr.bf16.mxu1 %v1688_v45 }
  0x53   :  { %917 = vmatpush2.bf16.msra.mxu0 %v1683_v46  ;;  %960 = vmatpush2.bf16.msra.mxu1 %v1686_v47 }
  0x54   :  { %918 = vmatprep.subr.bf16.mxu0 %v1691_v48  ;;  %961 = vmatprep.subr.bf16.mxu1 %v1694_v49 }
  0x57   :  { %919 = vmatpush2.bf16.msra.mxu0 %v1689_v50  ;;  %962 = vmatpush2.bf16.msra.mxu1 %v1692_v51  ;;  %v1733_v51 = vld [vmem:[#allocation4 + $0xb0] ss:$12 sps:$4 sm:$0xff]  }
  0x58   :  { %920 = vmatprep.subr.bf16.mxu0 %v1697_v52  ;;  %963 = vmatprep.subr.bf16.mxu1 %v1700_v53  ;;  %v1734_v52 = vld [vmem:[#allocation4 + $0x230] ss:$12 sps:$4 sm:$0xff]  }
  0x5b   :  { %921 = vmatpush2.bf16.msra.mxu0 %v1695_v54  ;;  %964 = vmatpush2.bf16.msra.mxu1 %v1698_v55  ;;  %v1735_v55 = vld [vmem:[#allocation4 + $0x158] ss:$12 sps:$4 sm:$0xff]  }
  0x5c   :  { %922 = vmatprep.subr.bf16.mxu0 %v1703_v56  ;;  %965 = vmatprep.subr.bf16.mxu1 %v1706_v57  ;;  %v1736_v56 = vld [vmem:[#allocation4 + $0x2d8] ss:$12 sps:$4 sm:$0xff]  }
  0x5d   :  { %v1737_v57 = vld [vmem:[#allocation4 + $0x98] ss:$12 sps:$4 sm:$0xff]  }
  0x5f   :  { %923 = vmatpush2.bf16.msra.mxu0 %v1701_v58  ;;  %966 = vmatpush2.bf16.msra.mxu1 %v1704_v59  ;;  %v1738_v58 = vld [vmem:[#allocation4 + $0x218] ss:$12 sps:$4 sm:$0xff]   ;;  %v1739_v59 = vld [vmem:[#allocation4 + $0x140] ss:$12 sps:$4 sm:$0xff]  }
  0x60   :  { %924 = vmatprep.subr.bf16.mxu0 %v1709_v60  ;;  %967 = vmatprep.subr.bf16.mxu1 %v1712_v61  ;;  %v1740_v60 = vld [vmem:[#allocation4 + $0x2c0] ss:$12 sps:$4 sm:$0xff]  }
  0x61   :  { %v1741_v61 = vld [vmem:[#allocation4 + $0x80] ss:$12 sps:$4 sm:$0xff]  }
  0x63   :  { %925 = vmatpush2.bf16.msra.mxu0 %v1707_v62  ;;  %968 = vmatpush2.bf16.msra.mxu1 %v1710_v63  ;;  %v1742_v62 = vld [vmem:[#allocation4 + $0x200] ss:$12 sps:$4 sm:$0xff]   ;;  %v1743_v63 = vld [vmem:[#allocation4 + $0x128] ss:$12 sps:$4 sm:$0xff]  }
  0x64   :  { %926 = vmatprep.subr.bf16.mxu0 %v1715_v0  ;;  %969 = vmatprep.subr.bf16.mxu1 %v1718_v1  ;;  %v1744_v0 = vld [vmem:[#allocation4 + $0x2a8] ss:$12 sps:$4 sm:$0xff]  }
  0x65   :  { %v1745_v1 = vld [vmem:[#allocation4 + $0x68] ss:$12 sps:$4 sm:$0xff]  }
  0x67   :  { %927 = vmatpush2.bf16.msra.mxu0 %v1713_v2  ;;  %970 = vmatpush2.bf16.msra.mxu1 %v1716_v3  ;;  %v1746_v2 = vld [vmem:[#allocation4 + $0x1e8] ss:$12 sps:$4 sm:$0xff]   ;;  %v1747_v3 = vld [vmem:[#allocation4 + $0x110] ss:$12 sps:$4 sm:$0xff]  }
  0x68   :  { %928 = vmatprep.subr.bf16.mxu0 %v1721_v4  ;;  %971 = vmatprep.subr.bf16.mxu1 %v1724_v5  ;;  %v1748_v4 = vld [vmem:[#allocation4 + $0x290] ss:$12 sps:$4 sm:$0xff]  }
  0x69   :  { %v1749_v5 = vld [vmem:[#allocation4 + $0x50] ss:$12 sps:$4 sm:$0xff]  }
  0x6b   :  { %929 = vmatpush2.bf16.msra.mxu0 %v1719_v6  ;;  %972 = vmatpush2.bf16.msra.mxu1 %v1722_v7  ;;  %v1750_v6 = vld [vmem:[#allocation4 + $0x1d0] ss:$12 sps:$4 sm:$0xff]   ;;  %v1751_v7 = vld [vmem:[#allocation4 + $0xf8] ss:$12 sps:$4 sm:$0xff]  }
  0x6c   :  { %930 = vmatprep.subr.bf16.mxu0 %v1727_v8  ;;  %973 = vmatprep.subr.bf16.mxu1 %v1730_v9  ;;  %v1752_v8 = vld [vmem:[#allocation4 + $0x278] ss:$12 sps:$4 sm:$0xff]  }
  0x6d   :  { %v1753_v9 = vld [vmem:[#allocation4 + $0x38] ss:$12 sps:$4 sm:$0xff]  }
  0x6f   :  { %931 = vmatpush2.bf16.msra.mxu0 %v1725_v10  ;;  %974 = vmatpush2.bf16.msra.mxu1 %v1728_v11  ;;  %v1754_v10 = vld [vmem:[#allocation4 + $0x1b8] ss:$12 sps:$4 sm:$0xff]   ;;  %v1755_v11 = vld [vmem:[#allocation4 + $0xe0] ss:$12 sps:$4 sm:$0xff]  }
  0x70   :  { %1516 = vmatprep.subr.bf16.mxu0 %v1731_v12  ;;  %1538 = vmatprep.subr.bf16.mxu1 %v1732_v13  ;;  %v1756_v12 = vld [vmem:[#allocation4 + $0x260] ss:$12 sps:$4 sm:$0xff]  }
  0x71   :  { %v1757_v13 = vld [vmem:[#allocation4 + $0x20] ss:$12 sps:$4 sm:$0xff]  }
  0xf2   :  { %v179_v21 = vpop.f32.mrf.mxu0  ;;  %v222_v22 = vpop.f32.mrf.mxu1 }
  0xf3   :  { %v180_v35 = vadd.f32 %v179_v21, %v84_v25  ;;  %v223_v36 = vadd.f32 %v222_v22, %v92_v26  ;;  %v1761_v21 = vld [vmem:[#allocation4 + $0x8] ss:$12 sps:$4 sm:$0xff]  }
  0xf4   :  { %v181_v27 = vpop.f32.mrf.mxu0  ;;  %v224_v28 = vpop.f32.mrf.mxu1  ;;  %v1762_v22 = vld [vmem:[#allocation4 + $0x188] ss:$12 sps:$4 sm:$0xff]  }
  0xf5   :  { %v182_v31 = vadd.f32 %v181_v27, %v88_v23  ;;  %v225_v32 = vadd.f32 %v224_v28, %v96_v24  ;;  %v231_v47 = vmax.f32 %v180_v35, 0.0  ;;  %v233_v48 = vmax.f32 %v223_v36, 0.0  ;;  %v1767_v27 = vld [vmem:[#allocation6 + $0x68] sm:$0xff]  }
  0xf6   :  { %v183_v29 = vpop.f32.mrf.mxu0  ;;  %v226_v30 = vpop.f32.mrf.mxu1  ;;  %v1768_v28 = vld [vmem:[#allocation6 + $0x28] sm:$0xff]  }
  0xf7   :  { %v184_v33 = vadd.f32 %v183_v29, %v84_v25  ;;  %v227_v34 = vadd.f32 %v226_v30, %v92_v26  ;;  %v232_v43 = vmax.f32 %v182_v31, 0.0  ;;  %v234_v44 = vmax.f32 %v225_v32, 0.0  ;;  %v1765_v25 = vld [vmem:[#allocation6 + $0x70] sm:$0xff]   ;;  %v1769_v29 = vld [vmem:[#allocation6 + $0x60] sm:$0xff]   ;;  %v1771_v31 = vld [vmem:[#allocation6 + $0x58] sm:$0xff]  }
  0xf8   :  { %v185_v37 = vpop.f32.mrf.mxu0  ;;  %v228_v38 = vpop.f32.mrf.mxu1  ;;  %v1766_v26 = vld [vmem:[#allocation6 + $0x30] sm:$0xff]   ;;  %v1770_v30 = vld [vmem:[#allocation6 + $0x20] sm:$0xff]   ;;  %v1772_v32 = vld [vmem:[#allocation6 + $0x18] sm:$0xff]  }
  0xf9   :  { %v186_v39 = vadd.f32 %v185_v37, %v88_v23  ;;  %v229_v40 = vadd.f32 %v228_v38, %v96_v24  ;;  %v235_v41 = vmax.f32 %v184_v33, 0.0  ;;  %v237_v42 = vmax.f32 %v227_v34, 0.0  ;;  %v1763_v23 = vld [vmem:[#allocation6 + $0x78] sm:$0xff]   ;;  %v1773_v33 = vld [vmem:[#allocation6 + $0x50] sm:$0xff]   ;;  %v1775_v35 = vld [vmem:[#allocation6 + $0x48] sm:$0xff]  }
  0xfa   :  { %v1764_v24 = vld [vmem:[#allocation6 + $0x38] sm:$0xff]   ;;  %v1774_v34 = vld [vmem:[#allocation6 + $0x10] sm:$0xff]   ;;  %v1776_v36 = vld [vmem:[#allocation6 + $0x8] sm:$0xff]  }
  0xfb   :  { %v236_v45 = vmax.f32 %v186_v39, 0.0  ;;  %v238_v46 = vmax.f32 %v229_v40, 0.0  ;;  %v1937_v53 = vpack.c.bf16 %v235_v41, %v231_v47  ;;  %v1939_v54 = vpack.c.bf16 %v237_v42, %v233_v48  ;;  %v1777_v37 = vld [vmem:[#allocation6 + $0x40] sm:$0xff]   ;;  %v1779_v39 = vld [vmem:[#allocation6 + $0xb8] sm:$0xff]   ;;  %v1780_v41 = vld [vmem:[#allocation6 + $0xb0] sm:$0xff]  }
  0xfc   :  { %v1778_v38 = vld [vmem:[#allocation6] sm:$0xff]   ;;  %v1865_v40 = vmov 0.0   ;;  %v1781_v42 = vld [vmem:[#allocation6 + $0xa8] sm:$0xff]  }
  0xfd   :  { %v240_v49 = vpack.c.bf16 %v236_v45, %v232_v43  ;;  %v242_v50 = vpack.c.bf16 %v238_v46, %v234_v44  ;;  %v1782_v43 = vld [vmem:[#allocation6 + $0xa0] sm:$0xff]   ;;  %v1783_v44 = vld [vmem:[#allocation6 + $0x98] sm:$0xff]   ;;  %v1784_v45 = vld [vmem:[#allocation6 + $0x90] sm:$0xff]  }
  0xfe   :  { %v1785_v46 = vld [vmem:[#allocation6 + $0x88] sm:$0xff]   ;;  %v1786_v47 = vld [vmem:[#allocation6 + $0x80] sm:$0xff]  }
  0xff   :  { %932 = vmatprep.mubr.bf16.mxu0 %v240_v49  ;;  %975 = vmatprep.mubr.bf16.mxu1 %v242_v50  ;;  %v371_v48 = vld [vmem:[%s1964_s4] sm:$0x7] }
 0x100   :  { %933 = vmatmul.mubr.bf16.vlgmr.msra.gmra.mxu0 %v1937_v53  ;;  %976 = vmatmul.mubr.bf16.vlgmr.msra.gmra.mxu1 %v1939_v54 }
 0x101   :  { %1517 = vmatpush3.bf16.msra.mxu0 %v1733_v51  ;;  %1539 = vmatpush3.bf16.msra.mxu1 %v1734_v52 }
 0x102   :  { %1018 = vmatprep.mubr.bf16.mxu0 %v240_v49  ;;  %1059 = vmatprep.mubr.bf16.mxu1 %v242_v50  ;;  %v380_v49 = vrot.slane %v371_v48, %v87_v16  ;;  %v376_v50 = vrot.slane %v371_v48, %v83_v18 }
 0x103   :  { %1518 = vmatprep.subr.bf16.mxu0 %v1735_v55  ;;  %1540 = vmatprep.subr.bf16.mxu1 %v1736_v56 }
 0x105   :  { %1519 = vmatpush3.bf16.msra.mxu0 %v1737_v57  ;;  %1541 = vmatpush3.bf16.msra.mxu1 %v1738_v58 }
 0x106   :  { %1520 = vmatprep.subr.bf16.mxu0 %v1739_v59  ;;  %1542 = vmatprep.subr.bf16.mxu1 %v1740_v60 }
 0x109   :  { %1521 = vmatpush3.bf16.msra.mxu0 %v1741_v61  ;;  %1543 = vmatpush3.bf16.msra.mxu1 %v1742_v62 }
 0x10a   :  { %1522 = vmatprep.subr.bf16.mxu0 %v1743_v63  ;;  %1544 = vmatprep.subr.bf16.mxu1 %v1744_v0 }
 0x10d   :  { %1523 = vmatpush3.bf16.msra.mxu0 %v1745_v1  ;;  %1545 = vmatpush3.bf16.msra.mxu1 %v1746_v2 }
 0x10e   :  { %1524 = vmatprep.subr.bf16.mxu0 %v1747_v3  ;;  %1546 = vmatprep.subr.bf16.mxu1 %v1748_v4 }
 0x111   :  { %1525 = vmatpush3.bf16.msra.mxu0 %v1749_v5  ;;  %1547 = vmatpush3.bf16.msra.mxu1 %v1750_v6 }
 0x112   :  { %1526 = vmatprep.subr.bf16.mxu0 %v1751_v7  ;;  %1548 = vmatprep.subr.bf16.mxu1 %v1752_v8 }
 0x115   :  { %1527 = vmatpush3.bf16.msra.mxu0 %v1753_v9  ;;  %1549 = vmatpush3.bf16.msra.mxu1 %v1754_v10  ;;  %v384_v9 = vrot.slane %v371_v48, %v91_v19 }
 0x116   :  { %1528 = vmatprep.subr.bf16.mxu0 %v1755_v11  ;;  %1550 = vmatprep.subr.bf16.mxu1 %v1756_v12 }
 0x119   :  { %1529 = vmatpush3.bf16.msra.mxu0 %v1757_v13  ;;  %1551 = vmatpush3.bf16.msra.mxu1 %v1758_v14 }
 0x11a   :  { %1530 = vmatprep.subr.bf16.mxu0 %v1759_v17  ;;  %1552 = vmatprep.subr.bf16.mxu1 %v1760_v20 }
 0x11d   :  { %1531 = vmatpush3.bf16.msra.mxu0 %v1761_v21  ;;  %1553 = vmatpush3.bf16.msra.mxu1 %v1762_v22 }
 0x11e   :  { %1560 = vmatprep.subr.bf16.mxu0 %v1763_v23  ;;  %1591 = vmatprep.subr.bf16.mxu1 %v1865_v40 }
 0x120   :  { %1019 = vmatmul.mubr.bf16.vlgmr.msra.gmra.mxu0 %v1937_v53  ;;  %1060 = vmatmul.mubr.bf16.vlgmr.msra.gmra.mxu1 %v1939_v54 }
 0x121   :  { %1561 = vmatpush3.bf16.msra.mxu0 %v1764_v24  ;;  %1592 = vmatpush3.bf16.msra.mxu1 %v1779_v39 }
 0x122   :  { %1562 = vmatprep.subr.bf16.mxu0 %v1765_v25  ;;  %1593 = vmatprep.subr.bf16.mxu1 %v1865_v40 }
 0x123   :  { %1607 = vmatprep.mubr.msk.bf16.mxu1 %vm1866_vm1, %v1865_v40 }
 0x125   :  { %1563 = vmatpush3.bf16.msra.mxu0 %v1766_v26  ;;  %1594 = vmatpush3.bf16.msra.mxu1 %v1780_v41 }
 0x126   :  { %1564 = vmatprep.subr.bf16.mxu0 %v1767_v27  ;;  %1595 = vmatprep.subr.bf16.mxu1 %v1865_v40 }
 0x129   :  { %1565 = vmatpush3.bf16.msra.mxu0 %v1768_v28  ;;  %1596 = vmatpush3.bf16.msra.mxu1 %v1781_v42 }
 0x12a   :  { %1566 = vmatprep.subr.bf16.mxu0 %v1769_v29  ;;  %1597 = vmatprep.subr.bf16.mxu1 %v1865_v40 }
 0x12d   :  { %1567 = vmatpush3.bf16.msra.mxu0 %v1770_v30  ;;  %1598 = vmatpush3.bf16.msra.mxu1 %v1782_v43 }
 0x12e   :  { %1568 = vmatprep.subr.bf16.mxu0 %v1771_v31  ;;  %1599 = vmatprep.subr.bf16.mxu1 %v1865_v40 }
 0x131   :  { %1569 = vmatpush3.bf16.msra.mxu0 %v1772_v32  ;;  %1600 = vmatpush3.bf16.msra.mxu1 %v1783_v44 }
 0x132   :  { %1570 = vmatprep.subr.bf16.mxu0 %v1773_v33  ;;  %1601 = vmatprep.subr.bf16.mxu1 %v1865_v40 }
 0x135   :  { %1571 = vmatpush3.bf16.msra.mxu0 %v1774_v34  ;;  %1602 = vmatpush3.bf16.msra.mxu1 %v1784_v45  ;;  %v1482_v34 = vld [vmem:[%s1966_s6] ss:$0 sm:$0xff] }
 0x136   :  { %1572 = vmatprep.subr.bf16.mxu0 %v1775_v35  ;;  %1603 = vmatprep.subr.bf16.mxu1 %v1865_v40 }
 0x139   :  { %1573 = vmatpush3.bf16.msra.mxu0 %v1776_v36  ;;  %1604 = vmatpush3.bf16.msra.mxu1 %v1785_v46 }
 0x13a   :  { %1574 = vmatprep.subr.bf16.mxu0 %v1777_v37  ;;  %1605 = vmatprep.subr.bf16.mxu1 %v1865_v40 }
 0x13d   :  { %1575 = vmatpush3.bf16.msra.mxu0 %v1778_v38  ;;  %1606 = vmatpush3.bf16.msra.mxu1 %v1786_v47 }
 0x1c0   :  { %v934_v51 = vpop.f32.mrf.mxu0  ;;  %v977_v52 = vpop.f32.mrf.mxu1 }
 0x1c1   :  { %v935_v56 = vadd.f32 %v934_v51, %v376_v50 }
 0x1c2   :  { %v936_v53 = vpop.f32.mrf.mxu0  ;;  %v979_v54 = vpop.f32.mrf.mxu1 }
 0x1c3   :  { %v937_v55 = vadd.f32 %v936_v53, %v380_v49  ;;  %v978_v0 = vadd.f32 %v977_v52, %v935_v56 }
 0x1c4   :  { %v938_v57 = vpop.f32.mrf.mxu0  ;;  %v981_v58 = vpop.f32.mrf.mxu1 }
 0x1c5   :  { %v939_v59 = vadd.f32 %v938_v57, %v376_v50  ;;  %v980_v61 = vadd.f32 %v979_v54, %v937_v55  ;;  %v1068_v18 = vmax.f32 %v978_v0, 0.0 }
 0x1c6   :  { %v940_v60 = vpop.f32.mrf.mxu0  ;;  %v983_v1 = vpop.f32.mrf.mxu1 }
 0x1c7   :  { %v982_v62 = vadd.f32 %v981_v58, %v939_v59  ;;  %v941_v63 = vadd.f32 %v940_v60, %v380_v49  ;;  %v1069_v3 = vmax.f32 %v980_v61, 0.0 }
 0x1c9   :  { %v984_v2 = vadd.f32 %v983_v1, %v941_v63  ;;  %v1071_v16 = vmax.f32 %v982_v62, 0.0 }
 0x1cb   :  { %v1072_v4 = vmax.f32 %v984_v2, 0.0  ;;  %v1074_v6 = vpack.c.bf16 %v1071_v16, %v1068_v18 }
 0x1cd   :  { %v1075_v5 = vpack.c.bf16 %v1072_v4, %v1069_v3 }
 0x1cf   :  { %1308 = vmatprep.mubr.bf16.mxu0 %v1075_v5 }
 0x1d0   :  { %1309 = vmatmul.mubr.bf16.vlgmr.msra.gmra.mxu0 %v1074_v6 }
 0x1e0   :  { %v1532_v7 = vpop.f32.mrf.mxu0  ;;  %v1554_v8 = vpop.f32.mrf.mxu1 }
 0x1e2   :  { %v1533_v10 = vpop.f32.mrf.mxu0  ;;  %v1555_v11 = vpop.f32.mrf.mxu1 }
 0x1e3   :  { %v1534_v12 = vadd.f32 %v1533_v10, %v1532_v7  ;;  %v1556_v22 = vadd.f32 %v1555_v11, %v1554_v8 }
 0x1e4   :  { %v1535_v13 = vpop.f32.mrf.mxu0  ;;  %v1557_v14 = vpop.f32.mrf.mxu1 }
 0x1e5   :  { %v1021_v17 = vadd.f32 %v1534_v12, %v384_v9 }
 0x1e6   :  { %v1536_v20 = vpop.f32.mrf.mxu0  ;;  %v1558_v21 = vpop.f32.mrf.mxu1 }
 0x1e7   :  { %v1537_v23 = vadd.f32 %v1536_v20, %v1535_v13  ;;  %v1062_v24 = vadd.f32 %v1556_v22, %v1021_v17  ;;  %v1559_v26 = vadd.f32 %v1558_v21, %v1557_v14 }
 0x1e9   :  { %v1024_v25 = vadd.f32 %v1537_v23, %v384_v9  ;;  %v1070_v28 = vmax.f32 %v1062_v24, 0.0 }
 0x1eb   :  { %v1065_v27 = vadd.f32 %v1559_v26, %v1024_v25 }
 0x1ed   :  { %v1073_v29 = vmax.f32 %v1065_v27, 0.0 }
 0x1ef   :  { %v1076_v30 = vpack.c.bf16 %v1073_v29, %v1070_v28 }
 0x1f1   :  { %1608 = vmatmul.mubr.bf16.vlgmr.msra.gmra.mxu1 %v1076_v30 }
 0x290   :  { %v1576_v15 = vpop.f32.mrf.mxu0 }
 0x292   :  { %v1577_v19 = vpop.f32.mrf.mxu0 }
 0x293   :  { %v1578_v32 = vadd.f32 %v1577_v19, %v1576_v15 }
 0x294   :  { %v1579_v31 = vpop.f32.mrf.mxu0 }
 0x295   :  { %v1311_v36 = vadd.f32 %v1578_v32, %v1482_v34 }
 0x296   :  { %v1580_v33 = vpop.f32.mrf.mxu0 }
 0x297   :  { %v1581_v35 = vadd.f32 %v1580_v33, %v1579_v31 }
 0x299   :  { %v1314_v40 = vadd.f32 %v1581_v35, %v1482_v34 }
 0x2b1   :  { %v1351_v37 = vpop.f32.mrf.mxu1 }
 0x2b2   :  { %v1352_v38 = vadd.f32 %v1351_v37, %v1311_v36 }
 0x2b3   :  { %v1609_v39 = vpop.f32.mrf.mxu1 }
 0x2b4   :  { %1787 = vtanh.f32 %v1352_v38 }
 0x2b5   :  { %v1354_v41 = vpop.f32.mrf.mxu1 }
 0x2b6   :  { %v1355_v42 = vadd.f32 %v1354_v41, %v1314_v40 }
 0x2b7   :  { %v1610_v43 = vpop.f32.mrf.mxu1 }
 0x2b8   :  { %1789 = vtanh.f32 %v1355_v42 }
 0x2c1   :  { %v1788_v44 = vpop.eup %1787 }
 0x2c5   :  { %v1790_v45 = vpop.eup %1789 }
 0x2c6   :  { %v1514_v46 = vpack.c.bf16 %v1790_v45, %v1788_v44 }
 0x2c8   :  { %1515 = vst [vmem:[%s1967_s7] sm:$0xff] %v1514_v46  }
 0x2c9   :  { %1374 = vsyncpa [#allocation3], 1 }
 0x2ca   :  { %1375 = vsyncpa [#allocation5], 1 }

</bundles_post_ra>
